<compile_context>
chip_gen: v7x
topology: tpu7x:2x2x1
jax: 0.10.0
libtpu: 0.0.40
codegen_flags: <defaults>
</compile_context>

<pallas_src>
import jax
import jax.numpy as jnp
from jax.experimental import pallas as pl
from jax.experimental.pallas import tpu as pltpu


def _round_up(x: int, m: int) -> int:
    return ((x + m - 1) // m) * m


def _pick_tile(dim: int, desired: int, granule: int) -> int:
    """Largest tile <= min(desired, dim) that is a multiple of `granule`
    and exactly divides `dim` (dim is assumed to be a multiple of granule)."""
    t = min(desired, dim)
    t = max((t // granule) * granule, granule)
    while dim % t != 0:
        t -= granule
    return t


def _linear_kernel_f32(x_ref, w_ref, b_ref, o_ref):
    # x_ref: (TM, TK)  w_ref: (TK, TN)  b_ref: (1, TN)  o_ref: (TM, TN) f32.
    # o_ref's index_map ignores k, so the output block stays VMEM-resident
    # across the K axis and doubles as the accumulator (no scratch needed).
    k = pl.program_id(2)
    partial = jnp.dot(x_ref[...], w_ref[...], preferred_element_type=jnp.float32)

    @pl.when(k == 0)
    def _init():
        # Bias folded into the init: added exactly once, in f32.
        o_ref[...] = b_ref[...] + partial

    @pl.when(k > 0)
    def _accum():
        o_ref[...] += partial


def _linear_kernel_acc(x_ref, w_ref, b_ref, o_ref, acc_ref):
    # Low-precision output path: keep a f32 accumulator in scratch, cast once.
    k = pl.program_id(2)
    partial = jnp.dot(x_ref[...], w_ref[...], preferred_element_type=jnp.float32)

    @pl.when(k == 0)
    def _init():
        acc_ref[...] = b_ref[...].astype(jnp.float32) + partial

    @pl.when(k > 0)
    def _accum():
        acc_ref[...] += partial

    @pl.when(k == pl.num_programs(2) - 1)
    def _finalize():
        o_ref[...] = acc_ref[...].astype(o_ref.dtype)


class LinearRegression:
    """Pallas TPU port of the PyTorch `linearRegression` module's forward.

    weight: (Out, In) [PyTorch convention], bias: (Out,).
    The expensive weight transpose + padding happens ONCE here, not per call.
    """

    def __init__(self, weight, bias, *, tm=512, tn=512, tk=512,
                 compute_dtype=None):
        Out, In = weight.shape
        assert bias.shape == (Out,)
        self.in_features = In
        self.out_features = Out
        self.compute_dtype = compute_dtype  # e.g. jnp.bfloat16 on v6e/v7x

        # Pad K/N to lane-dense multiples of 128. Padded rows/cols are zero,
        # so the contraction is exact; the wrapper slices the output back.
        Kp = _round_up(In, 128)
        Np = _round_up(Out, 128)
        self.Kp, self.Np = Kp, Np

        # (In, Out) is the native (K, N) MXU feed layout; done once.
        w_p = jnp.pad(weight.T, ((0, Kp - In), (0, Np - Out)))
        if compute_dtype is not None:
            w_p = w_p.astype(compute_dtype)
        self.w_p = w_p
        # Bias stays f32 so the add is exact regardless of compute dtype.
        self.b_p = jnp.pad(bias.reshape(1, Out).astype(jnp.float32),
                           ((0, 0), (0, Np - Out)))

        # Tiles are divisors of the padded dims -> no over-padding, and when
        # Kp <= tk the reduction collapses to a single step (fast path).
        self.tk = _pick_tile(Kp, tk, 128)
        self.tn = _pick_tile(Np, tn, 128)
        self._tm_desired = tm

    def __call__(self, x):
        B, In = x.shape
        assert In == self.in_features, "x feature dim must match in_features"
        Kp, Np = self.Kp, self.Np
        Out = self.out_features

        Mp = _round_up(B, 8)
        tm = _pick_tile(Mp, self._tm_desired, 8)
        tn, tk = self.tn, self.tk

        # v7x megacore: make sure the parallel (M, N) axes have >= 2 blocks
        # whenever the problem is big enough to split.
        if (Mp // tm) * (Np // tn) < 2:
            if Np >= 256:
                tn = _pick_tile(Np, Np // 2, 128)
            elif Mp >= 16:
                tm = _pick_tile(Mp, Mp // 2, 8)

        x_p = x if (Mp == B and Kp == In) else jnp.pad(
            x, ((0, Mp - B), (0, Kp - In)))
        if self.compute_dtype is not None:
            x_p = x_p.astype(self.compute_dtype)

        out_dtype = x.dtype
        grid = (Mp // tm, Np // tn, Kp // tk)

        direct_f32 = out_dtype == jnp.float32
        if direct_f32:
            kernel = _linear_kernel_f32
            scratch_shapes = []
        else:
            kernel = _linear_kernel_acc
            scratch_shapes = [pltpu.VMEM((tm, tn), jnp.float32)]

        in_itemsize = jnp.dtype(x_p.dtype).itemsize
        out_itemsize = jnp.dtype(out_dtype).itemsize

        # VMEM footprint: double-buffered input/output tiles (+ f32 scratch),
        # sized per-config so it is safe on v7x (64 MiB physical) while still
        # giving headroom; never below Mosaic's comfortable 16 MiB default.
        footprint = (
            2 * (tm * tk + tk * tn) * in_itemsize
            + 2 * tn * 4                      # bias tile (f32), double-buffered
            + 2 * tm * tn * out_itemsize      # output tile, double-buffered
            + (0 if direct_f32 else tm * tn * 4)
        )
        vmem_limit = int(min(max(2 * footprint, 16 * 1024 * 1024),
                             48 * 1024 * 1024))

        # Advisory cost estimate that reflects real traffic (tile re-reads).
        cost = pl.CostEstimate(
            flops=2 * Mp * Np * Kp,
            transcendentals=0,
            bytes_accessed=(
                (Np // tn) * Mp * Kp * in_itemsize   # x re-read per N tile
                + (Mp // tm) * Kp * Np * in_itemsize  # W re-read per M tile
                + Mp * Np * out_itemsize
                + Np * 4
            ),
        )

        out_p = pl.pallas_call(
            kernel,
            out_shape=jax.ShapeDtypeStruct((Mp, Np), out_dtype),
            grid_spec=pltpu.PrefetchScalarGridSpec(
                num_scalar_prefetch=0,
                grid=grid,
                in_specs=[
                    pl.BlockSpec((tm, tk), lambda i, j, k: (i, k)),  # x tile
                    pl.BlockSpec((tk, tn), lambda i, j, k: (k, j)),  # W^T tile
                    pl.BlockSpec((1, tn), lambda i, j, k: (0, j)),   # bias
                ],
                out_specs=pl.BlockSpec((tm, tn), lambda i, j, k: (i, j)),
                scratch_shapes=scratch_shapes,
            ),
            compiler_params=pltpu.CompilerParams(
                dimension_semantics=("parallel", "parallel", "arbitrary"),
                vmem_limit_bytes=vmem_limit,
            ),
            cost_estimate=cost,
        )(x_p, self.w_p, self.b_p)

        if Mp == B and Np == Out:
            return out_p
        return out_p[:B, :Out]


if __name__ == "__main__":
    # Small shapes consistent with linearRegression(inputSize, outputSize).
    batch, inputSize, outputSize = 8, 32, 16

    key = jax.random.PRNGKey(0)
    kx, kw, kb = jax.random.split(key, 3)

    x = jax.random.normal(kx, (batch, inputSize), dtype=jnp.float32)
    # Deterministic init mimicking torch.nn.Linear's uniform(-1/sqrt(in), 1/sqrt(in)).
    bound = 1.0 / (inputSize ** 0.5)
    weight = jax.random.uniform(
        kw, (outputSize, inputSize), minval=-bound, maxval=bound,
        dtype=jnp.float32)
    bias = jax.random.uniform(
        kb, (outputSize,), minval=-bound, maxval=bound, dtype=jnp.float32)

    # Parameters (transpose + pad) prepared exactly once here.
    model = LinearRegression(weight, bias)

    out = model(x)
    out = jax.block_until_ready(out)

    # Reference check against plain JAX.
    ref = x @ weight.T + bias
    assert out.shape == (batch, outputSize)
    assert jnp.allclose(out, ref, atol=1e-5, rtol=1e-5)

    print("KERNEL_OK")
</pallas_src>

<mosaic_0001>
module attributes {stable_mosaic.version = 11 : i64} {
  func.func @_linear_kernel_f32(%arg0: i32, %arg1: i32, %arg2: i32, %arg3: memref<8x128xf32, #tpu.memory_space<vmem>>, %arg4: memref<128x128xf32, #tpu.memory_space<vmem>>, %arg5: memref<1x128xf32, #tpu.memory_space<vmem>>, %arg6: memref<8x128xf32, #tpu.memory_space<vmem>>) attributes {dimension_semantics = [#tpu.dimension_semantics<parallel>, #tpu.dimension_semantics<parallel>, #tpu.dimension_semantics<arbitrary>], iteration_bounds = array<i64: 1, 1, 1>, scalar_prefetch = 0 : i64, scratch_operands = 0 : i64, tpu.core_type = #tpu.core_type<tc>, window_params = [{transform_indices = @transform_0, window_bounds = array<i64: 8, 128>}, {transform_indices = @transform_1, window_bounds = array<i64: 128, 128>}, {transform_indices = @transform_2, window_bounds = array<i64: 1, 128>}, {transform_indices = @transform_3, window_bounds = array<i64: 8, 128>}]} {
    %c0 = arith.constant 0 : index
    %c0_0 = arith.constant 0 : index
    %0 = vector.load %arg3[%c0, %c0_0] : memref<8x128xf32, #tpu.memory_space<vmem>>, vector<8x128xf32>
    %c0_1 = arith.constant 0 : index
    %c0_2 = arith.constant 0 : index
    %1 = vector.load %arg4[%c0_1, %c0_2] : memref<128x128xf32, #tpu.memory_space<vmem>>, vector<128x128xf32>
    %cst = arith.constant dense<0.000000e+00> : vector<8x128xf32>
    %2 = tpu.matmul %0, %1, %cst {dimension_numbers = #tpu.dot_dimension_numbers<[1], [0], [0], [1], [0, 0, 1, 1], [], []>} : vector<8x128xf32>, vector<128x128xf32>, vector<8x128xf32> -> vector<8x128xf32>
    %c0_i32 = arith.constant 0 : i32
    %3 = arith.cmpi eq, %arg2, %c0_i32 : i32
    %4 = arith.extui %3 : i1 to i32
    %c0_i32_3 = arith.constant 0 : i32
    %5 = arith.cmpi ne, %4, %c0_i32_3 : i32
    scf.if %5 {
      %c0_6 = arith.constant 0 : index
      %c0_7 = arith.constant 0 : index
      %9 = vector.load %arg5[%c0_6, %c0_7] : memref<1x128xf32, #tpu.memory_space<vmem>>, vector<1x128xf32>
      %10 = vector.broadcast %9 : vector<1x128xf32> to vector<8x128xf32>
      %11 = arith.addf %10, %2 : vector<8x128xf32>
      %c0_8 = arith.constant 0 : index
      %c0_9 = arith.constant 0 : index
      %12 = vector.load %arg6[%c0_8, %c0_9] : memref<8x128xf32, #tpu.memory_space<vmem>>, vector<8x128xf32>
      tpu.vector_store %arg6[%c0_8, %c0_9], %11 {strides = array<i32>} : memref<8x128xf32, #tpu.memory_space<vmem>>, vector<8x128xf32>,
    } else {
    }
    %c0_i32_4 = arith.constant 0 : i32
    %6 = arith.cmpi sgt, %arg2, %c0_i32_4 : i32
    %7 = arith.extui %6 : i1 to i32
    %c0_i32_5 = arith.constant 0 : i32
    %8 = arith.cmpi ne, %7, %c0_i32_5 : i32
    scf.if %8 {
      %c0_6 = arith.constant 0 : index
      %c0_7 = arith.constant 0 : index
      %9 = vector.load %arg6[%c0_6, %c0_7] : memref<8x128xf32, #tpu.memory_space<vmem>>, vector<8x128xf32>
      %10 = arith.addf %9, %2 : vector<8x128xf32>
      %c0_8 = arith.constant 0 : index
      %c0_9 = arith.constant 0 : index
      %11 = vector.load %arg6[%c0_8, %c0_9] : memref<8x128xf32, #tpu.memory_space<vmem>>, vector<8x128xf32>
      tpu.vector_store %arg6[%c0_8, %c0_9], %10 {strides = array<i32>} : memref<8x128xf32, #tpu.memory_space<vmem>>, vector<8x128xf32>,
    } else {
    }
    return
  }
  func.func @transform_0(%arg0: i32, %arg1: i32, %arg2: i32) -> (i32, i32) {
    %c0_i32 = arith.constant 0 : i32
    return %arg0, %arg2 : i32, i32
  }
  func.func @transform_1(%arg0: i32, %arg1: i32, %arg2: i32) -> (i32, i32) {
    %c0_i32 = arith.constant 0 : i32
    return %arg2, %arg1 : i32, i32
  }
  func.func @transform_2(%arg0: i32, %arg1: i32, %arg2: i32) -> (i32, i32) {
    %c0_i32 = arith.constant 0 : i32
    %c0_i32_0 = arith.constant 0 : i32
    return %c0_i32, %arg1 : i32, i32
  }
  func.func @transform_3(%arg0: i32, %arg1: i32, %arg2: i32) -> (i32, i32) {
    %c0_i32 = arith.constant 0 : i32
    return %arg0, %arg1 : i32, i32
  }
}

</mosaic_0001>

<bundles_post_ra>
// kernel: tpu_custom_call.1
= control target key start
LH: loop header
LB: loop body
LE: loop exit
PB: predicated region body
PF: predicated region fallthrough
CT: control target
= control target key end

     0   :  { %8 = vsyncpa [#allocation3], 0  ;;  %s395_s0 = inlined_call_operand.hbm [shape: f32[8,128], index: 0, kind: input, shape index: {}]   ;;  %s396_s1 = inlined_call_operand.hbm [shape: f32[128,128], index: 1, kind: input, shape index: {}]   ;;  %s397_s2 = inlined_call_operand.vmem [shape: f32[1,128], index: 2, kind: input, shape index: {}]   ;;  %s398_s3 = inlined_call_operand.hbm [shape: f32[8,128], index: 3, kind: output, shape index: {}]  }
   0x1   :  { %9 = vsyncpa [#allocation6], 0 }
   0x2   :  { %10 = vsyncpa [#allocation4], 0  ;;  %s321_s12 = smov [#allocation2]   ;;  %s322_s14 = smov [#allocation5]  }
   0x3   :  { %s17_s13 = sshll.u32 %s321_s12, 4  ;;  %s26_s15 = sshll.u32 %s322_s14, 4  ;;  %s18_s13 = int_to_ptr.vmem [resolvable:$true] %s17_s13  ;;  %s349_s15 = int_to_ptr.vmem [resolvable:$true] %s26_s15 }
   0x4   :  { %s249_s18 = scalar_lea.hbm %s395_s0, 128 }
   0x5   :  { %p250_p0 = scmp.ne.s32.totalorder %s395_s0, %s249_s18  ;;  %p253_p1 = scmp.lt.u32.totalorder %s249_s18, %s395_s0 }
   0x7   :  { %p255_p2 = pnand %p253_p1, %p250_p0 }
   0x9   :  { %258 = shalt.err (!%p255_p2)
}
   0xa   :  { %s259_s23 = scalar_lea.vmem %s18_s13, 128  ;;  %p264_p4 = scmp.lt.s32.totalorder %s18_s13, %s18_s13 }
   0xb   :  { %p260_p3 = scmp.ne.s32.totalorder %s18_s13, %s259_s23  ;;  %p265_p5 = scmp.lt.s32.totalorder %s259_s23, %s259_s23 }
   0xd   :  { %p266_p6 = por %p265_p5, %p264_p4 }
   0xf   :  { %p267_p7 = pnand %p266_p6, %p260_p3 }
  0x11   :  { %270 = shalt.err (!%p267_p7)
}
  0x12   :  { %20 = dma.hbm_to_vmem [thread:$0]  %s395_s0, 128, %s18_s13, [#allocation3]  }
  0x13   :  { %s271_s28 = scalar_lea.hbm %s396_s1, 2048 }
  0x14   :  { %p272_p8 = scmp.ne.s32.totalorder %s396_s1, %s271_s28  ;;  %p275_p9 = scmp.lt.u32.totalorder %s271_s28, %s396_s1 }
  0x16   :  { %p277_p10 = pnand %p275_p9, %p272_p8 }
  0x18   :  { %280 = shalt.err (!%p277_p10)
}
  0x19   :  { %s281_s6 = scalar_lea.vmem %s349_s15, 2048  ;;  %p286_p12 = scmp.lt.s32.totalorder %s349_s15, %s349_s15 }
  0x1a   :  { %p282_p11 = scmp.ne.s32.totalorder %s349_s15, %s281_s6  ;;  %p287_p13 = scmp.lt.s32.totalorder %s281_s6, %s281_s6 }
  0x1c   :  { %p288_p0 = por %p287_p13, %p286_p12 }
  0x1e   :  { %p289_p1 = pnand %p288_p0, %p282_p11 }
  0x20   :  { %292 = shalt.err (!%p289_p1)
}
  0x21   :  { %s323_s0 = smov 128   ;;  %s324_s7 = smov 8  }
  0x22   :  { %32 = dma.hbm_to_vmem [thread:$0]  %s396_s1, 2048, %s349_s15, [#allocation6], %s323_s0, %s323_s0, %s324_s7  }
  0x23   :  { %315 = dma.done.wait [#allocation3], 128  }
  0x24   :  { %316 = vsyncadd [#allocation3], 4294967168 }
  0x25   :  { %317 = dma.done.wait [#allocation6], 2048  }
  0x26   :  { %318 = vsyncadd [#allocation6], 4294965248  ;;  %v325_v0 = vmov 0.0|0.0   ;;  %vm326_vm0 = vmmov 0   ;;  %v327_v1 = vmov 0.0   ;;  %v42_v2 = vld [vmem:[#allocation5] sm:$0xff] }
  0x27   :  { %217 = vmatprep.subr.bf16.mxu0 %v325_v0  ;;  %214 = vmatprep.mubr.msk.f32.mxu0 %vm326_vm0, %v327_v1  ;;  %v43_v3 = vld [vmem:[#allocation5 + $0x8] sm:$0xff]  ;;  %v44_v4 = vld [vmem:[#allocation5 + $0x10] sm:$0xff]  ;;  %v45_v6 = vld [vmem:[#allocation5 + $0x18] sm:$0xff]  ;;  %s328_s11 = smov [#allocation7]  }
  0x28   :  { %v218_v5 = vpack.c.bf16 %v43_v3, %v42_v2  ;;  %v221_v7 = vpack.c.bf16 %v45_v6, %v44_v4  ;;  %v46_v8 = vld [vmem:[#allocation5 + $0x20] sm:$0xff]  ;;  %v47_v9 = vld [vmem:[#allocation5 + $0x28] sm:$0xff]  ;;  %v48_v11 = vld [vmem:[#allocation5 + $0x30] sm:$0xff]  ;;  %s154_s12 = sshll.u32 %s328_s11, 4  ;;  %s155_s12 = int_to_ptr.vmem [resolvable:$true] %s154_s12 }
  0x29   :  { %v224_v10 = vpack.c.bf16 %v47_v9, %v46_v8  ;;  %v49_v12 = vld [vmem:[#allocation5 + $0x38] sm:$0xff]  ;;  %v50_v14 = vld [vmem:[#allocation5 + $0x40] sm:$0xff]  ;;  %v51_v15 = vld [vmem:[#allocation5 + $0x48] sm:$0xff]  ;;  %s293_s13 = scalar_lea.vmem %s155_s12, 128  ;;  %p298_p3 = scmp.lt.s32.totalorder %s155_s12, %s155_s12 }
  0x2a   :  { %219 = vmatpush3.bf16.msra.mxu0 %v218_v5  ;;  %v227_v13 = vpack.c.bf16 %v49_v12, %v48_v11  ;;  %v230_v16 = vpack.c.bf16 %v51_v15, %v50_v14  ;;  %v52_v17 = vld [vmem:[#allocation5 + $0x50] sm:$0xff]  ;;  %v53_v18 = vld [vmem:[#allocation5 + $0x58] sm:$0xff]  ;;  %v54_v20 = vld [vmem:[#allocation5 + $0x60] sm:$0xff]  ;;  %p294_p2 = scmp.ne.s32.totalorder %s155_s12, %s293_s13  ;;  %p299_p4 = scmp.lt.s32.totalorder %s293_s13, %s293_s13 }
  0x2b   :  { %220 = vmatprep.subr.bf16.mxu0 %v325_v0  ;;  %v233_v19 = vpack.c.bf16 %v53_v18, %v52_v17  ;;  %v55_v21 = vld [vmem:[#allocation5 + $0x68] sm:$0xff]  ;;  %v56_v23 = vld [vmem:[#allocation5 + $0x70] sm:$0xff]  ;;  %v57_v24 = vld [vmem:[#allocation5 + $0x78] sm:$0xff] }
  0x2c   :  { %v236_v22 = vpack.c.bf16 %v55_v21, %v54_v20  ;;  %v239_v25 = vpack.c.bf16 %v57_v24, %v56_v23  ;;  %v41_v26 = vld [vmem:[#allocation2] sm:$0xff]  ;;  %p300_p5 = por %p299_p4, %p298_p3 }
  0x2d   :  { %v164_v27 = vld [vmem:[%s397_s2] ss:$0 sm:$0xff] }
  0x2e   :  { %222 = vmatpush3.bf16.msra.mxu0 %v221_v7  ;;  %p301_p6 = pnand %p300_p5, %p294_p2 }
  0x2f   :  { %223 = vmatprep.subr.bf16.mxu0 %v325_v0 }
  0x32   :  { %225 = vmatpush3.bf16.msra.mxu0 %v224_v10 }
  0x33   :  { %226 = vmatprep.subr.bf16.mxu0 %v325_v0 }
  0x36   :  { %228 = vmatpush3.bf16.msra.mxu0 %v227_v13 }
  0x37   :  { %229 = vmatprep.subr.bf16.mxu0 %v325_v0 }
  0x3a   :  { %231 = vmatpush3.bf16.msra.mxu0 %v230_v16 }
  0x3b   :  { %232 = vmatprep.subr.bf16.mxu0 %v325_v0 }
  0x3e   :  { %234 = vmatpush3.bf16.msra.mxu0 %v233_v19 }
  0x3f   :  { %235 = vmatprep.subr.bf16.mxu0 %v325_v0 }
  0x42   :  { %237 = vmatpush3.bf16.msra.mxu0 %v236_v22 }
  0x43   :  { %238 = vmatprep.subr.bf16.mxu0 %v325_v0 }
  0x46   :  { %240 = vmatpush3.bf16.msra.mxu0 %v239_v25 }
  0x49   :  { %215 = vmatmul.mubr.f32.vlgmr.msra.gmra.mrb[0].mxu0 %v41_v26 }
 0x11c   :  { %v124_v28 = vpop.f32.mrb[0].mxu0 }
 0x11d   :  { %v139_v29 = vadd.f32 %v164_v27, %v124_v28  ;;  %v216_v30 = vpop.f32.mrb[1].mxu0 }
 0x11f   :  { %140 = vst [vmem:[#allocation7] sm:$0xff] %v139_v29 }
 0x120   :  { %304 = shalt.err (!%p301_p6)
}
 0x121   :  { %s305_s16 = scalar_lea.hbm %s398_s3, 128 }
 0x122   :  { %p306_p7 = scmp.ne.s32.totalorder %s398_s3, %s305_s16  ;;  %p309_p8 = scmp.lt.u32.totalorder %s305_s16, %s398_s3 }
 0x124   :  { %p311_p9 = pnand %p309_p8, %p306_p7 }
 0x126   :  { %314 = shalt.err (!%p311_p9)
}
 0x127   :  { %157 = dma.vmem_to_hbm [thread:$0]  %s155_s12, 128, %s398_s3, [#allocation4]  }
 0x128   :  { %319 = dma.done.wait [#allocation4], 128  }
 0x129   :  { %320 = vsyncadd [#allocation4], 4294967168 }
 0x12a   :  { %161 = vsyncpa [#allocation3], 1 }
 0x12b   :  { %162 = vsyncpa [#allocation6], 1 }
 0x12c   :  { %163 = vsyncpa [#allocation4], 1 }

</bundles_post_ra>
